<compile_context>
chip_gen: v7x
topology: tpu7x:2x2x1
jax: 0.10.0
libtpu: 0.0.40
codegen_flags: <defaults>
</compile_context>

<pallas_src>
import numpy as np
import jax
import jax.numpy as jnp
from jax.experimental import pallas as pl
from jax.experimental.pallas import tpu as pltpu


def _bilinear_matrix_align_corners(n_in: int, n_out: int) -> np.ndarray:
    """Interpolation matrix matching F.interpolate(mode='bilinear', align_corners=True)."""
    A = np.zeros((n_out, n_in), dtype=np.float32)
    if n_in == 1:
        A[:, 0] = 1.0
        return A
    src = np.arange(n_out, dtype=np.float64) * (n_in - 1) / (n_out - 1)
    i0 = np.clip(np.floor(src).astype(np.int64), 0, n_in - 1)
    i1 = np.clip(i0 + 1, 0, n_in - 1)
    frac = (src - i0).astype(np.float32)
    A[np.arange(n_out), i0] += (1.0 - frac)
    A[np.arange(n_out), i1] += frac
    return A


def _fold_bn_cfirst(w, b, gamma, beta, mean, var, eps=1e-5):
    """Fold inference-mode BatchNorm into a (Cout, Cin) weight / (Cout,) bias."""
    s = gamma / jnp.sqrt(var + eps)                  # (Cout,)
    return w * s[:, None], (b - mean) * s + beta


# ----------------------------- kernel 1: psi (low-res gate map) ---------------
def _psi_kernel(g_ref, xs_ref, wg_ref, wx_ref, bw_ref, bpsi_ref, psi_ref):
    # Fused 1x1 convs (+BN) as two full-lane 2-D MXU matmuls on (C, Sg).
    pre = jnp.dot(wg_ref[...], g_ref[0], preferred_element_type=jnp.float32)
    pre = pre + jnp.dot(wx_ref[...], xs_ref[0], preferred_element_type=jnp.float32)
    bw = bw_ref[...]                                  # (C, 2): [:,0]=bias, [:,1]=psi w
    a = jnp.maximum(pre + bw[:, 0:1], 0.0)            # (C, Sg)  ReLU
    # psi 1-channel conv: single vectorized channel reduce (+ folded BN bias).
    z = jnp.sum(a * bw[:, 1:2], axis=0, keepdims=True)          # (1, Sg)
    psi_ref[0] = jax.nn.sigmoid(z + bpsi_ref[0])


# ----------------------------- kernel 2: separable bilinear upsample ----------
def _upsample_kernel(psi_ref, ah_ref, awt_ref, up_ref):
    psi2d = psi_ref[0, 0]                                        # (Hg, Wg)
    t = jnp.dot(psi2d, awt_ref[...], preferred_element_type=jnp.float32)   # (Hg, Wx)
    up_ref[0, 0] = jnp.dot(ah_ref[...], t,
                           preferred_element_type=jnp.float32)             # (Hx, Wx)


# ----------------------------- kernel 3: lane-dense gating --------------------
def _gate_kernel(x_ref, psi_ref, out_ref):
    # x_ref: (1, ct, Sx), psi_ref: (1, 1, Sx) -> broadcast over channel tile.
    out_ref[0] = (x_ref[0].astype(jnp.float32) * psi_ref[0]).astype(out_ref.dtype)


def attention_block(g_nchw, x_nchw, params, *, channel_tile=None):
    g = jnp.asarray(g_nchw)
    x = jnp.asarray(x_nchw)
    N, Fg, Hg, Wg = g.shape
    Nx, Fx, Hx, Wx = x.shape
    assert N == Nx and Hx == 2 * Hg and Wx == 2 * Wg, "x must be 2x spatial of g"
    Sg = Hg * Wg
    Sx = Hx * Wx

    # Fold inference-mode BN into the 1x1 conv weights (channel-first layout).
    wg_f, bg_f = _fold_bn_cfirst(params["wg"], params["bg"], params["g_gamma"],
                                 params["g_beta"], params["g_mean"], params["g_var"])
    wx_f, bx_f = _fold_bn_cfirst(params["wx"], params["bx"], params["x_gamma"],
                                 params["x_beta"], params["x_mean"], params["x_var"])
    wpsi_f, bpsi_f = _fold_bn_cfirst(params["wpsi"], params["bpsi"], params["p_gamma"],
                                     params["p_beta"], params["p_mean"], params["p_var"])
    C = wg_f.shape[0]
    bw = jnp.stack([bg_f + bx_f, wpsi_f[0]], axis=1).astype(jnp.float32)   # (C, 2)
    bpsi = bpsi_f.reshape(1).astype(jnp.float32)                           # (1,) -> SMEM

    # Low-res psi-path operands (free reshapes; the stride-2 slice is the only copy).
    g_flat = g.astype(jnp.float32).reshape(N, Fg, Sg)                      # (N, Fg, Sg)
    xs_flat = x[:, :, ::2, ::2].astype(jnp.float32).reshape(N, Fx, Sg)     # (N, Fx, Sg)

    A_h = jnp.asarray(_bilinear_matrix_align_corners(Hg, Hx))              # (Hx, Hg)
    A_wT = jnp.asarray(_bilinear_matrix_align_corners(Wg, Wx)).T           # (Wg, Wx)

    # ---- kernel 1: psi low-res (N, 1, Sg) ------------------------------------
    psi_lo = pl.pallas_call(
        _psi_kernel,
        out_shape=jax.ShapeDtypeStruct((N, 1, Sg), jnp.float32),
        grid=(N,),
        in_specs=[
            pl.BlockSpec((1, Fg, Sg), lambda n: (n, 0, 0)),
            pl.BlockSpec((1, Fx, Sg), lambda n: (n, 0, 0)),
            pl.BlockSpec((C, Fg), lambda n: (0, 0)),
            pl.BlockSpec((C, Fx), lambda n: (0, 0)),
            pl.BlockSpec((C, 2), lambda n: (0, 0)),
            pl.BlockSpec(memory_space=pltpu.MemorySpace.SMEM),     # psi bias scalar
        ],
        out_specs=pl.BlockSpec((1, 1, Sg), lambda n: (n, 0, 0)),
        compiler_params=pltpu.CompilerParams(
            dimension_semantics=("parallel",),
            vmem_limit_bytes=48 * 1024 * 1024),
    )(g_flat, xs_flat, wg_f.astype(jnp.float32), wx_f.astype(jnp.float32), bw, bpsi)

    # Free row-major reshape in HBM: (N,1,Sg) -> (N,1,Hg,Wg).
    psi_lo_2d = psi_lo.reshape(N, 1, Hg, Wg)

    # ---- kernel 2: bilinear upsample (align_corners=True) --------------------
    psi_up = pl.pallas_call(
        _upsample_kernel,
        out_shape=jax.ShapeDtypeStruct((N, 1, Hx, Wx), jnp.float32),
        grid=(N,),
        in_specs=[
            pl.BlockSpec((1, 1, Hg, Wg), lambda n: (n, 0, 0, 0)),
            pl.BlockSpec((Hx, Hg), lambda n: (0, 0)),
            pl.BlockSpec((Wg, Wx), lambda n: (0, 0)),
        ],
        out_specs=pl.BlockSpec((1, 1, Hx, Wx), lambda n: (n, 0, 0, 0)),
        compiler_params=pltpu.CompilerParams(
            dimension_semantics=("parallel",),
            vmem_limit_bytes=32 * 1024 * 1024),
    )(psi_lo_2d, A_h, A_wT)

    psi_flat = psi_up.reshape(N, 1, Sx)          # free (row-major contiguous)
    x_flat = x.reshape(N, Fx, Sx)                # free (row-major contiguous)

    # Channel-tile heuristic: ~4 MiB per block (working set ~4-5x with double
    # buffering -> well under the 48 MiB limit; safe on v7x's 64 MiB VMEM while
    # still amortizing per-grid-step overhead on v5e/v6e).
    if channel_tile is None:
        itemsize = jnp.dtype(x.dtype).itemsize
        budget = 4 * 1024 * 1024
        ct = max(1, min(Fx, budget // max(1, Sx * itemsize)))
        cands = [d for d in range(int(ct), 0, -1)
                 if Fx % d == 0 and (d % 8 == 0 or d == Fx)]
        ct = cands[0] if cands else Fx
    else:
        ct = channel_tile
    assert Fx % ct == 0 and (ct % 8 == 0 or ct == Fx), \
        "channel_tile must divide Fx and be a multiple of 8 (or equal Fx)"
    n_ct = Fx // ct

    # ---- kernel 3: lane-dense gate  out = x * psi_up -------------------------
    # TODO(synk): if a profile shows exposed DMA on the x stream, raise the x
    # BlockSpec to pipeline_mode=pl.Buffered(3).
    out_flat = pl.pallas_call(
        _gate_kernel,
        out_shape=jax.ShapeDtypeStruct((N, Fx, Sx), x.dtype),
        grid=(N, n_ct),
        in_specs=[
            pl.BlockSpec((1, ct, Sx), lambda n, c: (n, c, 0)),    # x channel tile
            pl.BlockSpec((1, 1, Sx), lambda n, c: (n, 0, 0)),     # psi_up (per image)
        ],
        out_specs=pl.BlockSpec((1, ct, Sx), lambda n, c: (n, c, 0)),
        compiler_params=pltpu.CompilerParams(
            dimension_semantics=("parallel", "parallel"),
            vmem_limit_bytes=48 * 1024 * 1024),
    )(x_flat, psi_flat)

    return out_flat.reshape(N, Fx, Hx, Wx)


def reference_nchw(g, x, params):
    """Pure-JAX reference mirroring the PyTorch forward (inference-mode BN)."""
    def conv1x1(inp, w, b, stride=1):
        inp = inp[:, :, ::stride, ::stride]
        return jnp.einsum("nchw,oc->nohw", inp, w) + b[None, :, None, None]

    def bn(inp, gamma, beta, mean, var, eps=1e-5):
        s = gamma / jnp.sqrt(var + eps)
        return (inp - mean[None, :, None, None]) * s[None, :, None, None] \
               + beta[None, :, None, None]

    g1 = bn(conv1x1(g, params["wg"], params["bg"]),
            params["g_gamma"], params["g_beta"], params["g_mean"], params["g_var"])
    x1 = bn(conv1x1(x, params["wx"], params["bx"], stride=2),
            params["x_gamma"], params["x_beta"], params["x_mean"], params["x_var"])
    a = jax.nn.relu(g1 + x1)
    psi = jax.nn.sigmoid(bn(conv1x1(a, params["wpsi"], params["bpsi"]),
                            params["p_gamma"], params["p_beta"],
                            params["p_mean"], params["p_var"]))
    N, _, Hg, Wg = psi.shape
    Hx, Wx = x.shape[2], x.shape[3]
    A_h = jnp.asarray(_bilinear_matrix_align_corners(Hg, Hx))
    A_w = jnp.asarray(_bilinear_matrix_align_corners(Wg, Wx))
    psi_up = jnp.einsum("oh,nhw,pw->nop", A_h, psi[:, 0], A_w)
    return x * psi_up[:, None, :, :]


if __name__ == "__main__":
    key = jax.random.PRNGKey(0)
    N, Fg, Fx, C = 2, 8, 16, 16
    Hg = Wg = 16
    Hx, Wx = 2 * Hg, 2 * Wg

    ks = jax.random.split(key, 20)
    g = jax.random.normal(ks[0], (N, Fg, Hg, Wg), jnp.float32)
    x = jax.random.normal(ks[1], (N, Fx, Hx, Wx), jnp.float32)

    params = {
        "wg": jax.random.normal(ks[2], (C, Fg), jnp.float32) * 0.2,
        "bg": jax.random.normal(ks[3], (C,), jnp.float32) * 0.1,
        "g_gamma": jax.random.uniform(ks[4], (C,), jnp.float32, 0.5, 1.5),
        "g_beta": jax.random.normal(ks[5], (C,), jnp.float32) * 0.1,
        "g_mean": jax.random.normal(ks[6], (C,), jnp.float32) * 0.1,
        "g_var": jax.random.uniform(ks[7], (C,), jnp.float32, 0.5, 1.5),
        "wx": jax.random.normal(ks[8], (C, Fx), jnp.float32) * 0.2,
        "bx": jax.random.normal(ks[9], (C,), jnp.float32) * 0.1,
        "x_gamma": jax.random.uniform(ks[10], (C,), jnp.float32, 0.5, 1.5),
        "x_beta": jax.random.normal(ks[11], (C,), jnp.float32) * 0.1,
        "x_mean": jax.random.normal(ks[12], (C,), jnp.float32) * 0.1,
        "x_var": jax.random.uniform(ks[13], (C,), jnp.float32, 0.5, 1.5),
        "wpsi": jax.random.normal(ks[14], (1, C), jnp.float32) * 0.2,
        "bpsi": jax.random.normal(ks[15], (1,), jnp.float32) * 0.1,
        "p_gamma": jax.random.uniform(ks[16], (1,), jnp.float32, 0.5, 1.5),
        "p_beta": jax.random.normal(ks[17], (1,), jnp.float32) * 0.1,
        "p_mean": jax.random.normal(ks[18], (1,), jnp.float32) * 0.1,
        "p_var": jax.random.uniform(ks[19], (1,), jnp.float32, 0.5, 1.5),
    }

    # channel_tile=8 -> gate grid (N, 2): exercises the multi-tile, all-parallel path.
    out = attention_block(g, x, params, channel_tile=8)
    out = jax.block_until_ready(out)

    ref = reference_nchw(g, x, params)
    np.testing.assert_allclose(np.asarray(out), np.asarray(ref), rtol=1e-4, atol=1e-4)

    print("KERNEL_OK")
</pallas_src>

<mosaic_0001>
module attributes {stable_mosaic.version = 11 : i64} {
  func.func @_psi_kernel(%arg0: i32, %arg1: memref<1x8x256xf32, #tpu.memory_space<vmem>>, %arg2: memref<1x16x256xf32, #tpu.memory_space<vmem>>, %arg3: memref<16x8xf32, #tpu.memory_space<vmem>>, %arg4: memref<16x16xf32, #tpu.memory_space<vmem>>, %arg5: memref<16x2xf32, #tpu.memory_space<vmem>>, %arg6: memref<1xf32, #tpu.memory_space<smem>>, %arg7: memref<1x1x256xf32, #tpu.memory_space<vmem>>) attributes {dimension_semantics = [#tpu.dimension_semantics<parallel>], iteration_bounds = array<i64: 2>, scalar_prefetch = 0 : i64, scratch_operands = 0 : i64, tpu.core_type = #tpu.core_type<tc>, window_params = [{transform_indices = @transform_0, window_bounds = array<i64: 1, 8, 256>}, {transform_indices = @transform_1, window_bounds = array<i64: 1, 16, 256>}, {pipeline_mode = #tpu.pipeline_mode<synchronous>, transform_indices = @transform_2, window_bounds = array<i64: 16, 8>}, {pipeline_mode = #tpu.pipeline_mode<synchronous>, transform_indices = @transform_3, window_bounds = array<i64: 16, 16>}, {pipeline_mode = #tpu.pipeline_mode<synchronous>, transform_indices = @transform_4, window_bounds = array<i64: 16, 2>}, {transform_indices = @transform_5, window_bounds = array<i64: 1>}, {transform_indices = @transform_6, window_bounds = array<i64: 1, 1, 256>}]} {
    %c0 = arith.constant 0 : index
    %c0_0 = arith.constant 0 : index
    %0 = vector.load %arg3[%c0, %c0_0] : memref<16x8xf32, #tpu.memory_space<vmem>>, vector<16x8xf32>
    %c0_1 = arith.constant 0 : index
    %c0_2 = arith.constant 0 : index
    %c0_3 = arith.constant 0 : index
    %1 = vector.load %arg1[%c0_1, %c0_2, %c0_3] : memref<1x8x256xf32, #tpu.memory_space<vmem>>, vector<1x8x256xf32>
    %2 = vector.shape_cast %1 : vector<1x8x256xf32> to vector<8x256xf32>
    %cst = arith.constant dense<0.000000e+00> : vector<16x256xf32>
    %3 = tpu.matmul %0, %2, %cst {dimension_numbers = #tpu.dot_dimension_numbers<[1], [0], [0], [1], [0, 0, 1, 1], [], []>} : vector<16x8xf32>, vector<8x256xf32>, vector<16x256xf32> -> vector<16x256xf32>
    %c0_4 = arith.constant 0 : index
    %c0_5 = arith.constant 0 : index
    %4 = vector.load %arg4[%c0_4, %c0_5] : memref<16x16xf32, #tpu.memory_space<vmem>>, vector<16x16xf32>
    %c0_6 = arith.constant 0 : index
    %c0_7 = arith.constant 0 : index
    %c0_8 = arith.constant 0 : index
    %5 = vector.load %arg2[%c0_6, %c0_7, %c0_8] : memref<1x16x256xf32, #tpu.memory_space<vmem>>, vector<1x16x256xf32>
    %6 = vector.shape_cast %5 : vector<1x16x256xf32> to vector<16x256xf32>
    %cst_9 = arith.constant dense<0.000000e+00> : vector<16x256xf32>
    %7 = tpu.matmul %4, %6, %cst_9 {dimension_numbers = #tpu.dot_dimension_numbers<[1], [0], [0], [1], [0, 0, 1, 1], [], []>} : vector<16x16xf32>, vector<16x256xf32>, vector<16x256xf32> -> vector<16x256xf32>
    %8 = arith.addf %3, %7 : vector<16x256xf32>
    %c0_10 = arith.constant 0 : index
    %c0_11 = arith.constant 0 : index
    %9 = vector.load %arg5[%c0_10, %c0_11] : memref<16x2xf32, #tpu.memory_space<vmem>>, vector<16x2xf32>
    %10 = vector.extract_strided_slice %9 {offsets = [0, 0], sizes = [16, 1], strides = [1, 1]} : vector<16x2xf32> to vector<16x1xf32>
    %11 = vector.broadcast %10 : vector<16x1xf32> to vector<16x256xf32>
    %12 = arith.addf %8, %11 : vector<16x256xf32>
    %cst_12 = arith.constant 0.000000e+00 : f32
    %13 = vector.broadcast %cst_12 : f32 to vector<16x256xf32>
    %14 = arith.maximumf %12, %13 : vector<16x256xf32>
    %15 = vector.extract_strided_slice %9 {offsets = [0, 1], sizes = [16, 1], strides = [1, 1]} : vector<16x2xf32> to vector<16x1xf32>
    %16 = vector.broadcast %15 : vector<16x1xf32> to vector<16x256xf32>
    %17 = arith.mulf %14, %16 : vector<16x256xf32>
    %cst_13 = arith.constant dense<0.000000e+00> : vector<256xf32>
    %18 = vector.multi_reduction <add>, %17, %cst_13 [0] : vector<16x256xf32> to vector<256xf32>
    %19 = vector.shape_cast %18 : vector<256xf32> to vector<1x256xf32>
    %c0_14 = arith.constant 0 : index
    %20 = memref.load %arg6[%c0_14] : memref<1xf32, #tpu.memory_space<smem>>
    %21 = vector.broadcast %20 : f32 to vector<1x256xf32>
    %22 = arith.addf %19, %21 : vector<1x256xf32>
    %23 = arith.negf %22 : vector<1x256xf32>
    %24 = math.exp %23 : vector<1x256xf32>
    %cst_15 = arith.constant 1.000000e+00 : f32
    %25 = vector.broadcast %cst_15 : f32 to vector<1x256xf32>
    %26 = arith.addf %25, %24 : vector<1x256xf32>
    %27 = arith.divf %25, %26 : vector<1x256xf32>
    %c0_16 = arith.constant 0 : index
    %c0_17 = arith.constant 0 : index
    %c0_18 = arith.constant 0 : index
    %28 = vector.load %arg7[%c0_16, %c0_17, %c0_18] : memref<1x1x256xf32, #tpu.memory_space<vmem>>, vector<1x1x256xf32>
    %29 = vector.shape_cast %28 : vector<1x1x256xf32> to vector<1x256xf32>
    %30 = vector.shape_cast %27 : vector<1x256xf32> to vector<1x1x256xf32>
    tpu.vector_store %arg7[%c0_16, %c0_17, %c0_18], %30 {strides = array<i32>} : memref<1x1x256xf32, #tpu.memory_space<vmem>>, vector<1x1x256xf32>,
    return
  }
  func.func @transform_0(%arg0: i32) -> (i32, i32, i32) {
    %c0_i32 = arith.constant 0 : i32
    %c0_i32_0 = arith.constant 0 : i32
    %c0_i32_1 = arith.constant 0 : i32
    return %arg0, %c0_i32, %c0_i32_0 : i32, i32, i32
  }
  func.func @transform_1(%arg0: i32) -> (i32, i32, i32) {
    %c0_i32 = arith.constant 0 : i32
    %c0_i32_0 = arith.constant 0 : i32
    %c0_i32_1 = arith.constant 0 : i32
    return %arg0, %c0_i32, %c0_i32_0 : i32, i32, i32
  }
  func.func @transform_2(%arg0: i32) -> (i32, i32) {
    %c0_i32 = arith.constant 0 : i32
    %c0_i32_0 = arith.constant 0 : i32
    %c0_i32_1 = arith.constant 0 : i32
    return %c0_i32, %c0_i32_0 : i32, i32
  }
  func.func @transform_3(%arg0: i32) -> (i32, i32) {
    %c0_i32 = arith.constant 0 : i32
    %c0_i32_0 = arith.constant 0 : i32
    %c0_i32_1 = arith.constant 0 : i32
    return %c0_i32, %c0_i32_0 : i32, i32
  }
  func.func @transform_4(%arg0: i32) -> (i32, i32) {
    %c0_i32 = arith.constant 0 : i32
    %c0_i32_0 = arith.constant 0 : i32
    %c0_i32_1 = arith.constant 0 : i32
    return %c0_i32, %c0_i32_0 : i32, i32
  }
  func.func @transform_5(%arg0: i32) -> i32 {
    %c0_i32 = arith.constant 0 : i32
    %c0_i32_0 = arith.constant 0 : i32
    return %c0_i32 : i32
  }
  func.func @transform_6(%arg0: i32) -> (i32, i32, i32) {
    %c0_i32 = arith.constant 0 : i32
    %c0_i32_0 = arith.constant 0 : i32
    %c0_i32_1 = arith.constant 0 : i32
    return %arg0, %c0_i32, %c0_i32_0 : i32, i32, i32
  }
}

</mosaic_0001>

<bundles_post_ra>
// kernel: tpu_custom_call.1
= control target key start
LH: loop header
LB: loop body
LE: loop exit
PB: predicated region body
PF: predicated region fallthrough
CT: control target
= control target key end

     0   :  { %s1077_s0 = inlined_call_operand.vmem [shape: f32[2,8,256], index: 0, kind: input, shape index: {}]   ;;  %s1078_s1 = inlined_call_operand.hbm [shape: f32[2,16,256], index: 1, kind: input, shape index: {}]   ;;  %s1079_s2 = inlined_call_operand.vmem [shape: f32[16,8], index: 2, kind: input, shape index: {}]   ;;  %s1080_s3 = inlined_call_operand.vmem [shape: f32[16,16], index: 3, kind: input, shape index: {}]   ;;  %s1081_s4 = inlined_call_operand.vmem [shape: f32[16,2], index: 4, kind: input, shape index: {}]   ;;  %s1082_s5 = inlined_call_operand.<no memory space> [shape: f32[1], index: 5, kind: input, shape index: {}]   ;;  %s1083_s6 = inlined_call_operand.hbm [shape: f32[2,1,256], index: 6, kind: output, shape index: {}]  }
   0x1   :  { %11 = sst [smem:[#allocation2]] %s1082_s5 }
   0x2   :  { %12 = vsyncpa [#allocation4], 0 }
   0x3   :  { %14 = vsyncpa [#allocation4 + $0x1], 0 }
   0x4   :  { %15 = vsyncpa [#allocation5], 0 }
   0x5   :  { %17 = vsyncpa [#allocation5 + $0x1], 0  ;;  %s891_s23 = smov 0   ;;  %s893_s24 = smov 0  }
   0x6   :  { %s895_s25 = smov 0   ;;  %s897_s26 = smov 0  }
   0x7 LB: > { %s912_s5 = sadd.s32 4294967295, %s843_s26   ;;  %s651_s27 = sadd.s32 4294967294, %s843_s26   ;;  %s843_s26 = sphi %s897_s26, %s1096_s26   ;;  %s839_s25 = sphi %s895_s25, %s1095_s25   ;;  %s835_s24 = sphi %s893_s24, %s1094_s24   ;;  %s831_s23 = sphi %s891_s23, %s1093_s23  }
   0x8   : > { %s916_s28 = sadd.s32 1, %s843_s26   ;;  %s56_s29 = sadd.s32 1, %s839_s25 }
   0x9   : > { %s53_s30 = ssub.s32 %s843_s26, %s916_s28  ;;  %p63_p0 = scmp.ne.s32.totalorder %s839_s25, %s835_s24 }
   0xa   : > { %p54_p1 = scmp.eq.s32.totalorder %s53_s30, 0  ;;  %p64_p2 = scmp.eq.s32.totalorder %s843_s26, 0 }
   0xb   : > { %p69_p3 = scmp.ne.s32.totalorder %s835_s24, %s831_s23  ;;  %p70_p4 = scmp.eq.s32.totalorder %s912_s5, 0 }
   0xc   : > { %s928_s7 = scalar_select %p54_p1, %s839_s25, %s56_s29  }
   0xd   : > { %p930_p5 = por %p64_p2, %p63_p0  ;;  %p934_p6 = por %p70_p4, %p69_p3 }
   0xe   : > { %p177_p7 = scmp.eq.s32.totalorder %s912_s5, 1  ;;  %p183_p8 = scmp.eq.s32.totalorder %s651_s27, 1 }
   0xf   : > { %p696_p10 = scmp.lt.s32.totalorder %s843_s26, 2  ;;  %s223_s12 = sand.u32 1, %s839_s25  }
  0x10   : > { %p941_p11 = por %p177_p7, %p63_p0  ;;  %p945_p12 = por %p183_p8, %p69_p3 }
  0x11   : > { %s673_s13 = sshll.u32 %s843_s26, 9  ;;  %s654_s14 = sshll.u32 %s223_s12, 5 }
  0x12   : > { %s1087_s10 = scalar_select %p941_p11, 1, 0 }
  0x13   : > { %s1088_s11 = scalar_select %p945_p12, 1, 0 }
  0x14   : > { %s954_s17 = scalar_lea.hbm %s1078_s1, %s673_s13  ;;  %s227_s18 = scalar_lea.vmem [#allocation3], %s654_s14 }
  0x15   : > { %s234_s19 = sshll.u32 %s227_s18, 4  ;;  %p958_p13 = pnand %p696_p10, %p930_p5  ;;  %s962_s19 = int_to_ptr.vmem [resolvable:$true] %s234_s19 }
  0x16   : > { %s964_s21 = scalar_lea.sflag [#allocation4], %s223_s12  ;;  %s747_s22 = scalar_lea.hbm %s954_s17, 512 }
  0x17   : > { %p748_p0 = scmp.ne.s32.totalorder %s954_s17, %s747_s22  ;;  %p749_p1 = pneg %p958_p13 }
  0x18   : > { %s752_s30 = scalar_lea.hbm %s1078_s1, 1024  ;;  %p753_p4 = scmp.lt.u32.totalorder %s954_s17, %s1078_s1 }
  0x19   : > { %p750_p2 = pnand %p749_p1, %p748_p0  ;;  %p754_p5 = scmp.lt.u32.totalorder %s752_s30, %s747_s22 }
  0x1a   : > { %p756_p8 = scmp.lt.u32.totalorder %s747_s22, %s954_s17 }
  0x1b   : > { %p751_p3 = pneg %p750_p2  ;;  %p755_p7 = por %p754_p5, %p753_p4 }
  0x1d   : > { %p757_p10 = por %p756_p8, %p755_p7 }
  0x1f   : > { %p758_p9 = pnand %p757_p10, %p751_p3 }
  0x21   : > { %761 = shalt.err (!%p758_p9)
}
  0x22   : > { %s762_s12 = scalar_lea.vmem %s962_s19, 512  ;;  %s845_s14 = smov [#allocation3]  }
  0x23   : > { %p763_p0 = scmp.ne.s32.totalorder %s962_s19, %s762_s12  ;;  %s767_s15 = sshll.u32 %s845_s14, 4  ;;  %s768_s15 = int_to_ptr.vmem [resolvable:$false] %s767_s15 }
  0x24   : > { %s769_s16 = scalar_lea.vmem %s768_s15, 1024  ;;  %p770_p11 = scmp.lt.s32.totalorder %s962_s19, %s768_s15 }
  0x25   : > { %p765_p2 = pnand %p763_p0, %p749_p1  ;;  %p771_p4 = scmp.lt.s32.totalorder %s769_s16, %s762_s12 }
  0x27   : > { %p766_p12 = pneg %p765_p2  ;;  %p772_p5 = por %p771_p4, %p770_p11 }
  0x29   : > { %p773_p7 = pnand %p772_p5, %p766_p12 }
  0x2b   : > { %776 = shalt.err (!%p773_p7)
}
  0x2c   : > { %s846_s18 = smov 256   ;;  %s847_s22 = smov 16  }
  0x2d   : > { %691 = dma.hbm_to_vmem [thread:$0]  (!%p958_p13), %s954_s17, 512, %s962_s19, %s964_s21, %s846_s18, %s846_s18, %s847_s22  }
  0x2e   : > { %p657_p9 = scmp.ge.s32.totalorder %s843_s26, 1  ;;  %p242_p1 = scmp.lt.s32.totalorder %s843_s26, 3 }
  0x30   : > { %p243_p3 = pnand %p657_p9, %p242_p1 }
  0x31   : > { %s995_s27 = sand.u32 (!%p243_p3), 1, %s835_s24  }
  0x32   : > { %246 = sbr.rel (%p243_p3) target bundleno = 354 (0x162), region = 44  ;;  %s658_s29 = sshll.u32 (!%p243_p3), %s995_s27, 5 }
  0x33   : > { %s249_s30 = scalar_lea.sflag (!%p243_p3), [#allocation4], %s995_s27  ;;  %s252_s8 = scalar_lea.vmem (!%p243_p3), [#allocation3], %s658_s29 }
  0x39   : > { %822 = dma.done.wait (%p934_p6), %s249_s30, 512  }
  0x3a   : > { %824 = vsyncadd (%p934_p6), %s249_s30, 4294966784  ;;  %p286_p11 = scmp.lt.s32.totalorder %s912_s5, 1  ;;  %v848_v0 = vmov 0.0   ;;  %v849_v1 = vmov 0   ;;  %v850_v2 = vmov 1   ;;  %v298_v3 = vld [vmem:[%s252_s8 + $0x8] sm:$0xff] }
  0x3b   : > { %456 = vmatprep.mubr.f32.mxu0 %v848_v0  ;;  %372 = vmatprep.mubr.f32.mxu1 %v848_v0  ;;  %v300_v4 = vld [vmem:[%s252_s8 + $0x18] sm:$0xff]  ;;  %v297_v5 = vld [vmem:[%s252_s8] sm:$0xff]  ;;  %v299_v7 = vld [vmem:[%s252_s8 + $0x10] sm:$0xff]  ;;  %vm385_vm0 = vcmask 64512   ;;  %vm301_vm1 = vcmask 130048   ;;  %s515_s20 = sld [smem:[#allocation2]] }
  0x3c   : > { %s287_s17 = scalar_select %p286_p11, %s912_s5, 1  ;;  %736 = vset.pattern.permute.xlu0 %v849_v1  ;;  %737 = vset.pattern.permute.xlu1 %v850_v2  ;;  %v676_v6 = vpack.c.bf16 %v300_v4, %v298_v3  ;;  %v678_v10 = vpack.c.bf16 %v299_v7, %v297_v5  ;;  %v291_v11 = vld [vmem:[%s1079_s2] sm:$0xff]  ;;  %v292_v14 = vld [vmem:[%s1079_s2 + $0x8] sm:$0xff]  ;;  %v851_v4 = vmov 1966171168  }
  0x3d   : > { %v469_v12 = vld [vmem:[%s1081_s4] sm:$0xff]  ;;  %v470_v15 = vld [vmem:[%s1081_s4 + $0x8] sm:$0xff]  ;;  %v535_v5 = vunpack.c.l.s4 %v851_v4  ;;  %s659_s21 = sshll.u32 %s995_s27, 1  ;;  %s555_s18 = scalar_lea.sflag [#allocation5], %s995_s27 }
  0x3e   : > { %s674_s19 = sshll.u32 %s287_s17, 4  ;;  %677 = vmatprep.subr.bf16.mxu1 %v676_v6  ;;  %v295_v13 = vld [vmem:[%s1080_s3] sm:$0xff]  ;;  %473 = vperm.xlu0 %736, %v469_v12   ;;  %v296_v16 = vld [vmem:[%s1080_s3 + $0x8] sm:$0xff]  ;;  %v537_v6 = vlaneseq  ;;  %s285_s9 = scalar_lea.vmem [#allocation6], %s659_s21 }
  0x3f   : > { %s290_s13 = scalar_lea.vmem %s1077_s0, %s674_s19  ;;  %679 = vmatpush1.bf16.msra.mxu1 %v678_v10  ;;  %490 = vperm.xlu1 %737, %v469_v12   ;;  %v536_v7 = vunpack.c.0.s8 %v535_v5  ;;  %s569_s12 = sshll.u32 %s285_s9, 4  ;;  %s1035_s12 = int_to_ptr.vmem [resolvable:$true] %s569_s12 }
  0x40   : > { %v294_v8 = vld [vmem:[%s290_s13 + $0x8] sm:$0xff]  ;;  %v293_v9 = vld [vmem:[%s290_s13] sm:$0xff]  ;;  %s675_s13 = sshll.u32 %s912_s5, 5  ;;  %vm551_vm2 = vcmp.lt.s32.totalorder %v537_v6, 256  ;;  %s777_s22 = scalar_lea.vmem %s1035_s12, 32 }
  0x41   : > { %392 = vmatprep.subr.mxu0 %v294_v8  ;;  %v516_v56 = vstv %s515_s20  ;;  %v538_v8 = vshrl.u32 %v537_v6, 7  ;;  %s1033_s16 = scalar_lea.hbm %s1083_s6, %s675_s13  ;;  %p778_p6 = scmp.ne.s32.totalorder %s1035_s12, %s777_s22 }
  0x42   : > { %393 = vmatpush1.msra.mxu0 %v293_v9  ;;  %662 = vmatmul.mubr.msk.f32.vlgmr.msra.gmra.mrb[0].mxu1 %vm301_vm1, %v295_v13  ;;  %p1090_p12 = scmp.ne.s32.totalorder %s1087_s10, 0  ;;  %s852_s5 = smov [#allocation6]  }
  0x43   : > { %664 = vmatmul.mubr.msk.f32.vlgmr.msra.gmra.mrb[0].mxu0 %vm385_vm0, %v291_v11  ;;  %378 = vmatprep.mubr.f32.mxu1 %v848_v0  ;;  %v539_v10 = vsub.s32 %v536_v7, %v538_v8  ;;  %s781_s29 = sshll.u32 %s852_s5, 4  ;;  %s782_s29 = int_to_ptr.vmem [resolvable:$false] %s781_s29 }
  0x44   : > { %462 = vmatprep.mubr.f32.mxu0 %v848_v0  ;;  %478 = vperm.xlu0 %736, %v470_v15   ;;  %p779_p13 = pnand %p778_p6, %p1090_p12  ;;  %s783_s30 = scalar_lea.vmem %s782_s29, 64 }
  0x45   : > { %494 = vperm.xlu1 %737, %v470_v15   ;;  %p784_p10 = scmp.lt.s32.totalorder %s1035_s12, %s782_s29  ;;  %p785_p0 = scmp.lt.s32.totalorder %s783_s30, %s777_s22 }
  0x46   : > { %663 = vmatmul.mubr.msk.f32.gmra.mrb[2].mxu1 %vm301_vm1, %v296_v16  ;;  %p780_p8 = pneg %p779_p13 }
  0x47   : > { %665 = vmatmul.mubr.msk.f32.gmra.mrb[2].mxu0 %vm385_vm0, %v292_v14  ;;  %p786_p2 = por %p785_p0, %p784_p10 }
  0x48   : > { %738 = vset.pattern.permute.xlu0 %v850_v2 }
  0x49   : > { %p787_p4 = pnand %p786_p2, %p780_p8 }
  0xbd   : > { %v474_v19 = vpop.permute.xlu0 %473 }
  0xbe   : > { %v491_v28 = vpop.permute.xlu1 %490 }
  0xc3   : > { %v479_v32 = vpop.permute.xlu0 %478 }
  0xc4   : > { %v495_v39 = vpop.permute.xlu1 %494 }
 0x115   : > { %v374_v20 = vpop.f32.mrb[0].mxu1 }
 0x116   : > { %v458_v17 = vpop.f32.mrb[0].mxu0  ;;  %v376_v22 = vpop.f32.mrb[1].mxu1 }
 0x117   : > { %v460_v18 = vpop.f32.mrb[1].mxu0  ;;  %v459_v21 = vadd.f32 %v458_v17, %v374_v20 }
 0x118   : > { %v461_v24 = vadd.f32 %v460_v18, %v376_v22 }
 0x119   : > { %v481_v26 = vadd.f32 %v474_v19, %v459_v21  ;;  %v380_v29 = vpop.f32.mrb[2].mxu1 }
 0x11a   : > { %v464_v23 = vpop.f32.mrb[2].mxu0  ;;  %v482_v27 = vadd.f32 %v474_v19, %v461_v24  ;;  %v382_v31 = vpop.f32.mrb[3].mxu1 }
 0x11b   : > { %v466_v25 = vpop.f32.mrb[3].mxu0  ;;  %v465_v30 = vadd.f32 %v464_v23, %v380_v29  ;;  %v485_v34 = vmax.f32 %v481_v26, 0.0 }
 0x11c   : > { %v467_v33 = vadd.f32 %v466_v25, %v382_v31  ;;  %v486_v36 = vmax.f32 %v482_v27, 0.0 }
 0x11d   : > { %v483_v35 = vadd.f32 %v479_v32, %v465_v30  ;;  %v497_v41 = vmul.f32 %v491_v28, %v485_v34 }
 0x11e   : > { %v484_v37 = vadd.f32 %v479_v32, %v467_v33  ;;  %v498_v43 = vmul.f32 %v491_v28, %v486_v36 }
 0x11f   : > { %v487_v38 = vmax.f32 %v483_v35, 0.0 }
 0x120   : > { %v488_v40 = vmax.f32 %v484_v37, 0.0 }
 0x121   : > { %v499_v42 = vmul.f32 %v495_v39, %v487_v38 }
 0x122   : > { %v500_v44 = vmul.f32 %v495_v39, %v488_v40 }
 0x123   : > { %v501_v45 = vadd.f32 %v499_v42, %v497_v41 }
 0x124   : > { %v508_v46 = vadd.f32 %v500_v44, %v498_v43 }
 0x125   : > { %v502_v47 = vrot.slane %v501_v45, 4 }
 0x126   : > { %v509_v48 = vrot.slane %v508_v46, 4 }
 0x127   : > { %v503_v49 = vadd.f32 %v502_v47, %v501_v45 }
 0x128   : > { %v510_v50 = vadd.f32 %v509_v48, %v508_v46 }
 0x129   : > { %v504_v51 = vrot.slane %v503_v49, 2 }
 0x12a   : > { %v511_v52 = vrot.slane %v510_v50, 2 }
 0x12b   : > { %v505_v53 = vadd.f32 %v504_v51, %v503_v49 }
 0x12c   : > { %v512_v54 = vadd.f32 %v511_v52, %v510_v50 }
 0x12d   : > { %v506_v55 = vrot.slane %v505_v53, 1 }
 0x12e   : > { %v513_v57 = vrot.slane %v512_v54, 1 }
 0x12f   : > { %v507_v58 = vadd.f32 %v506_v55, %v505_v53 }
 0x130   : > { %v514_v59 = vadd.f32 %v513_v57, %v512_v54 }
 0x131   : > { %v517_v60 = vadd.f32 %v516_v56, %v507_v58 }
 0x132   : > { %v518_v61 = vadd.f32 %v516_v56, %v514_v59 }
 0x133   : > { %v666_v62 = vmul.f32 -1.442695, %v517_v60 }
 0x134   : > { %v667_v63 = vmul.f32 -1.442695, %v518_v61 }
 0x135   : > { %739 = vpow2.f32 %v666_v62 }
 0x136   : > { %741 = vpow2.f32 %v667_v63 }
 0x13f   : > { %v740_v0 = vpop.eup %739 }
 0x140   : > { %v742_v1 = vpop.eup %741  ;;  %v525_v2 = vadd.f32 1.0, %v740_v0 }
 0x141   : > { %v526_v3 = vadd.f32 1.0, %v742_v1 }
 0x142   : > { %743 = vrcp.f32 %v525_v2 }
 0x143   : > { %745 = vrcp.f32 %v526_v3 }
 0x14c   : > { %v744_v9 = vpop.eup %743 }
 0x14d   : > { %v746_v11 = vpop.eup %745 }
 0x14e   : > { %v533_v12 = vcombine.low %v744_v9, %v746_v11 }
 0x150   : > { %v540_v13 = vrot.slane %v533_v12, %v539_v10 }
 0x152   : > { %v547_v14 = vrot.slane %v540_v13, %v539_v10 }
 0x154   : > { %553 = vst.msk [vmem:[%s285_s9] sm:$0x3] %vm551_vm2, %v547_v14 }
 0x155   : > { %790 = shalt.err (!%p787_p4)
}
 0x156   : > { %s791_s27 = scalar_lea.hbm %s1033_s16, 32  ;;  %s795_s19 = scalar_lea.hbm %s1083_s6, 64 }
 0x157   : > { %p792_p5 = scmp.ne.s32.totalorder %s1033_s16, %s791_s27  ;;  %p796_p1 = scmp.lt.u32.totalorder %s1033_s16, %s1083_s6 }
 0x158   : > { %p797_p3 = scmp.lt.u32.totalorder %s795_s19, %s791_s27  ;;  %p799_p6 = scmp.lt.u32.totalorder %s791_s27, %s1033_s16 }
 0x159   : > { %p793_p7 = pnand %p792_p5, %p1090_p12 }
 0x15a   : > { %p798_p11 = por %p797_p3, %p796_p1 }
 0x15b   : > { %p794_p9 = pneg %p793_p7 }
 0x15c   : > { %p800_p13 = por %p799_p6, %p798_p11 }
 0x15e   : > { %p801_p8 = pnand %p800_p13, %p794_p9 }
 0x160   : > { %804 = shalt.err (!%p801_p8)
}
 0x161   : > { %686 = dma.vmem_to_hbm [thread:$0]  (%p1090_p12), %s1035_s12, 32, %s1033_s16, %s555_s18  }
 0x162 PF: > { %s581_s13 = sand.u32 1, %s831_s23   ;;  %p1091_p10 = scmp.ne.s32.totalorder %s1088_s11, 0 }
 0x163   : > { %p1092_p0 = scmp.ge.s32.totalorder %s843_s26, 2  ;;  %s582_s9 = scalar_lea.sflag [#allocation5], %s581_s13 }
 0x165   : > { %p693_p2 = pnand %p1092_p0, %p1091_p10 }
 0x167   : > { %826 = dma.done.wait (!%p693_p2), %s582_s9, 32  }
 0x168   : > { %828 = vsyncadd (!%p693_p2), %s582_s9, 4294967264  ;;  %p20_p4 = scmp.ge.s32.totalorder %s916_s28, 4   ;;  %s1093_s23 = smov %s835_s24 }
 0x169   : > { %s1094_s24 = smov %s839_s25  ;;  %s1095_s25 = smov %s928_s7 }
 0x16a   : > { %s1096_s26 = smov %s916_s28  ;;  %22 = sbr.rel (!%p20_p4) target bundleno = 7 (0x7), region = 92 }
 0x171   :  { %587 = vsyncpa [#allocation4], 1 }
 0x172   :  { %589 = vsyncpa [#allocation4 + $0x1], 1 }
 0x173   :  { %590 = vsyncpa [#allocation5], 1 }
 0x174   :  { %592 = vsyncpa [#allocation5 + $0x1], 1 }

</bundles_post_ra>
